<compile_context>
chip_gen: v7x
topology: tpu7x:2x2x1
jax: 0.10.0
libtpu: 0.0.40
codegen_flags: <defaults>
</compile_context>

<pallas_src>
import numpy as np
import jax
import jax.numpy as jnp
from jax.experimental import pallas as pl
from jax.experimental.pallas import tpu as pltpu


# ----------------------------------------------------------------------------
# Pallas kernel: CBAM forward for `bt` batch elements per grid step.
# ----------------------------------------------------------------------------
def cbam_kernel(x_ref, w1_ref, b1_ref, w2_ref, b2_ref, k_ref, o_ref):
    # x_ref : (bt, C, HW)      VMEM
    # w1_ref: (Cr, C)          VMEM   (torch Linear1 weight)
    # b1_ref: (Cr, 1)          VMEM
    # w2_ref: (C, Cr)          VMEM   (torch Linear2 weight)
    # b2_ref: (C, 1)           VMEM
    # k_ref : (2*HW, HW)       VMEM   folded 7x7 SAM conv operator
    # o_ref : (bt, C, HW)      VMEM
    bt, C, HW = x_ref.shape
    f32 = jnp.float32
    inv_hw = 1.0 / float(HW)
    inv_c = 1.0 / float(C)

    w1 = w1_ref[...]
    b1 = b1_ref[...]
    w2 = w2_ref[...]
    b2 = b2_ref[...]
    kmat = k_ref[...]

    # bt is a small static block count -> cheap unroll; all heavy work inside
    # is fully vectorized over channels / pixels.
    for b in range(bt):
        x2 = x_ref[b].astype(f32)                                  # (C, HW)

        # ---------------- CAM: channel attention ----------------
        mx = jnp.max(x2, axis=1, keepdims=True)                    # (C, 1)
        av = jnp.sum(x2, axis=1, keepdims=True) * inv_hw           # (C, 1)
        pooled = jnp.concatenate([mx, av], axis=1)                 # (C, 2)

        h = jnp.dot(w1, pooled, preferred_element_type=f32) + b1   # (Cr, 2)
        h = jnp.maximum(h, 0.0)
        z = jnp.dot(w2, h, preferred_element_type=f32) + b2        # (C, 2)
        att = jax.nn.sigmoid(z[:, 0:1] + z[:, 1:2])                # (C, 1)

        cam = att * x2                                             # (C, HW)

        # ---------------- SAM: spatial attention ----------------
        ch_max = jnp.max(cam, axis=0, keepdims=True)               # (1, HW)
        ch_avg = jnp.sum(cam, axis=0, keepdims=True) * inv_c       # (1, HW)
        stacked = jnp.concatenate([ch_max, ch_avg], axis=1)        # (1, 2*HW)

        # Exact 7x7 "same" conv as a single MXU matmul with the folded operator.
        conv = jnp.dot(stacked, kmat, preferred_element_type=f32)  # (1, HW)

        # ---------------- gate + residual ----------------
        o_ref[b] = (conv * cam + x2).astype(o_ref.dtype)           # (C, HW)


# ----------------------------------------------------------------------------
# Host-side precompute: fold the (1, 2, 7, 7) conv weights (padding=3, no bias)
# into a dense (2*HW, HW) operator acting on the flattened [max | avg] map.
# ----------------------------------------------------------------------------
def _conv_matrix(conv_w, H, W):
    w = np.asarray(conv_w, dtype=np.float32).reshape(2, 7, 7)
    HW = H * W
    K = np.zeros((2, HW, HW), np.float32)
    for c in range(2):
        for yq in range(H):
            for xq in range(W):
                q = yq * W + xq
                for ky in range(7):
                    yp = yq + ky - 3
                    if not (0 <= yp < H):
                        continue
                    for kx in range(7):
                        xp = xq + kx - 3
                        if not (0 <= xp < W):
                            continue
                        K[c, yp * W + xp, q] += w[c, ky, kx]
    return K.reshape(2 * HW, HW)


# ----------------------------------------------------------------------------
# Wrapper
# ----------------------------------------------------------------------------
def cbam_pallas(x, W1, b1, W2, b2, conv_w, *, batch_block=None):
    """x: (B, C, H, W) f32.  W1:(Cr,C) b1:(Cr,) W2:(C,Cr) b2:(C,) conv_w:(1,2,7,7)."""
    B, C, H, Wd = x.shape
    HW = H * Wd
    Cr = W1.shape[0]

    # Pick a batch block: amortize per-step pipeline overhead for large B while
    # keeping the (parallel) grid length >= 2 so both v7x TensorCores get work.
    if batch_block is None:
        batch_block = 1
        for cand in (8, 4, 2):
            if B % cand == 0 and B // cand >= 2:
                batch_block = cand
                break
    bt = batch_block
    assert B % bt == 0, "batch_block must divide B"

    x_flat = x.reshape(B, C, HW)                     # lane-dense layout
    b1_k = b1.reshape(Cr, 1)
    b2_k = b2.reshape(C, 1)
    kmat = jnp.asarray(_conv_matrix(conv_w, H, Wd))  # (2*HW, HW), built once

    # Per-step VMEM footprint is tiny (block ~ bt*C*HW*4 B, K = 2*HW*HW*4 B),
    # comfortably under the v7x 64 MiB / default scoped limits.
    out_flat = pl.pallas_call(
        cbam_kernel,
        out_shape=jax.ShapeDtypeStruct((B, C, HW), x.dtype),
        grid=(B // bt,),
        in_specs=[
            pl.BlockSpec((bt, C, HW), lambda i: (i, 0, 0)),
            pl.BlockSpec((Cr, C), lambda i: (0, 0)),
            pl.BlockSpec((Cr, 1), lambda i: (0, 0)),
            pl.BlockSpec((C, Cr), lambda i: (0, 0)),
            pl.BlockSpec((C, 1), lambda i: (0, 0)),
            pl.BlockSpec((2 * HW, HW), lambda i: (0, 0)),
        ],
        out_specs=pl.BlockSpec((bt, C, HW), lambda i: (i, 0, 0)),
        compiler_params=pltpu.CompilerParams(
            dimension_semantics=("parallel",)),
    )(x_flat, W1, b1_k, W2, b2_k, kmat)

    return out_flat.reshape(B, C, H, Wd)


# ----------------------------------------------------------------------------
# Pure-JAX reference (mirrors the PyTorch forward) for validation.
# ----------------------------------------------------------------------------
def cbam_reference(x, W1, b1, W2, b2, conv_w):
    mx = jnp.max(x, axis=(2, 3))               # (B, C)
    av = jnp.mean(x, axis=(2, 3))              # (B, C)

    def mlp(v):
        h = jax.nn.relu(v @ W1.T + b1)
        return h @ W2.T + b2

    att = jax.nn.sigmoid(mlp(mx) + mlp(av))[:, :, None, None]
    cam = att * x
    ch_max = jnp.max(cam, axis=1, keepdims=True)
    ch_avg = jnp.mean(cam, axis=1, keepdims=True)
    concat = jnp.concatenate([ch_max, ch_avg], axis=1)   # (B, 2, H, W)
    conv = jax.lax.conv_general_dilated(
        concat, conv_w, window_strides=(1, 1), padding=[(3, 3), (3, 3)],
        dimension_numbers=("NCHW", "OIHW", "NCHW"))
    sam = conv * cam
    return sam + x


# ----------------------------------------------------------------------------
if __name__ == "__main__":
    B, C, H, W, r = 2, 4, 16, 16, 2
    Cr = C // r

    key = jax.random.PRNGKey(0)
    kx, k1, k2, k3, k4, k5 = jax.random.split(key, 6)
    x = jax.random.normal(kx, (B, C, H, W), jnp.float32)
    W1 = jax.random.normal(k1, (Cr, C), jnp.float32) * 0.5   # Linear(C -> C//r)
    b1 = jax.random.normal(k2, (Cr,), jnp.float32) * 0.1
    W2 = jax.random.normal(k3, (C, Cr), jnp.float32) * 0.5   # Linear(C//r -> C)
    b2 = jax.random.normal(k4, (C,), jnp.float32) * 0.1
    conv_w = jax.random.normal(k5, (1, 2, 7, 7), jnp.float32) * 0.1  # SAM conv, no bias

    out = cbam_pallas(x, W1, b1, W2, b2, conv_w)
    out = jax.block_until_ready(out)

    ref = cbam_reference(x, W1, b1, W2, b2, conv_w)
    err = float(jnp.max(jnp.abs(out - ref)))
    if out.shape != ref.shape or err > 1e-3:
        raise AssertionError(f"mismatch: shape {out.shape} vs {ref.shape}, max abs err {err}")

    print("KERNEL_OK")
</pallas_src>

<mosaic_0001>
module attributes {stable_mosaic.version = 11 : i64} {
  func.func @cbam_kernel(%arg0: i32, %arg1: memref<1x4x256xf32, #tpu.memory_space<vmem>>, %arg2: memref<2x4xf32, #tpu.memory_space<vmem>>, %arg3: memref<2x1xf32, #tpu.memory_space<vmem>>, %arg4: memref<4x2xf32, #tpu.memory_space<vmem>>, %arg5: memref<4x1xf32, #tpu.memory_space<vmem>>, %arg6: memref<512x256xf32, #tpu.memory_space<vmem>>, %arg7: memref<1x4x256xf32, #tpu.memory_space<vmem>>) attributes {dimension_semantics = [#tpu.dimension_semantics<parallel>], iteration_bounds = array<i64: 2>, scalar_prefetch = 0 : i64, scratch_operands = 0 : i64, tpu.core_type = #tpu.core_type<tc>, window_params = [{transform_indices = @transform_0, window_bounds = array<i64: 1, 4, 256>}, {pipeline_mode = #tpu.pipeline_mode<synchronous>, transform_indices = @transform_1, window_bounds = array<i64: 2, 4>}, {pipeline_mode = #tpu.pipeline_mode<synchronous>, transform_indices = @transform_2, window_bounds = array<i64: 2, 1>}, {pipeline_mode = #tpu.pipeline_mode<synchronous>, transform_indices = @transform_3, window_bounds = array<i64: 4, 2>}, {pipeline_mode = #tpu.pipeline_mode<synchronous>, transform_indices = @transform_4, window_bounds = array<i64: 4, 1>}, {pipeline_mode = #tpu.pipeline_mode<synchronous>, transform_indices = @transform_5, window_bounds = array<i64: 512, 256>}, {transform_indices = @transform_6, window_bounds = array<i64: 1, 4, 256>}]} {
    %c0 = arith.constant 0 : index
    %c0_0 = arith.constant 0 : index
    %0 = vector.load %arg2[%c0, %c0_0] : memref<2x4xf32, #tpu.memory_space<vmem>>, vector<2x4xf32>
    %c0_1 = arith.constant 0 : index
    %c0_2 = arith.constant 0 : index
    %1 = vector.load %arg3[%c0_1, %c0_2] : memref<2x1xf32, #tpu.memory_space<vmem>>, vector<2x1xf32>
    %c0_3 = arith.constant 0 : index
    %c0_4 = arith.constant 0 : index
    %2 = vector.load %arg4[%c0_3, %c0_4] : memref<4x2xf32, #tpu.memory_space<vmem>>, vector<4x2xf32>
    %c0_5 = arith.constant 0 : index
    %c0_6 = arith.constant 0 : index
    %3 = vector.load %arg5[%c0_5, %c0_6] : memref<4x1xf32, #tpu.memory_space<vmem>>, vector<4x1xf32>
    %c0_7 = arith.constant 0 : index
    %c0_8 = arith.constant 0 : index
    %4 = vector.load %arg6[%c0_7, %c0_8] : memref<512x256xf32, #tpu.memory_space<vmem>>, vector<512x256xf32>
    %c0_9 = arith.constant 0 : index
    %c0_10 = arith.constant 0 : index
    %c0_11 = arith.constant 0 : index
    %5 = vector.load %arg1[%c0_9, %c0_10, %c0_11] : memref<1x4x256xf32, #tpu.memory_space<vmem>>, vector<1x4x256xf32>
    %6 = vector.shape_cast %5 : vector<1x4x256xf32> to vector<4x256xf32>
    %cst = arith.constant dense<0xFF800000> : vector<4xf32>
    %7 = vector.multi_reduction <maximumf>, %6, %cst [1] : vector<4x256xf32> to vector<4xf32>
    %8 = vector.shape_cast %7 : vector<4xf32> to vector<4x1xf32>
    %cst_12 = arith.constant dense<0.000000e+00> : vector<4xf32>
    %9 = vector.multi_reduction <add>, %6, %cst_12 [1] : vector<4x256xf32> to vector<4xf32>
    %10 = vector.shape_cast %9 : vector<4xf32> to vector<4x1xf32>
    %cst_13 = arith.constant 3.906250e-03 : f32
    %11 = vector.broadcast %cst_13 : f32 to vector<4x1xf32>
    %12 = arith.mulf %10, %11 : vector<4x1xf32>
    %13 = tpu.concatenate %8, %12 in 1 : vector<4x1xf32>, vector<4x1xf32> -> vector<4x2xf32>
    %cst_14 = arith.constant dense<0.000000e+00> : vector<2x2xf32>
    %14 = tpu.matmul %0, %13, %cst_14 {dimension_numbers = #tpu.dot_dimension_numbers<[1], [0], [0], [1], [0, 0, 1, 1], [], []>} : vector<2x4xf32>, vector<4x2xf32>, vector<2x2xf32> -> vector<2x2xf32>
    %15 = vector.broadcast %1 : vector<2x1xf32> to vector<2x2xf32>
    %16 = arith.addf %14, %15 : vector<2x2xf32>
    %cst_15 = arith.constant 0.000000e+00 : f32
    %17 = vector.broadcast %cst_15 : f32 to vector<2x2xf32>
    %18 = arith.maximumf %16, %17 : vector<2x2xf32>
    %cst_16 = arith.constant dense<0.000000e+00> : vector<4x2xf32>
    %19 = tpu.matmul %2, %18, %cst_16 {dimension_numbers = #tpu.dot_dimension_numbers<[1], [0], [0], [1], [0, 0, 1, 1], [], []>} : vector<4x2xf32>, vector<2x2xf32>, vector<4x2xf32> -> vector<4x2xf32>
    %20 = vector.broadcast %3 : vector<4x1xf32> to vector<4x2xf32>
    %21 = arith.addf %19, %20 : vector<4x2xf32>
    %22 = vector.extract_strided_slice %21 {offsets = [0, 0], sizes = [4, 1], strides = [1, 1]} : vector<4x2xf32> to vector<4x1xf32>
    %23 = vector.extract_strided_slice %21 {offsets = [0, 1], sizes = [4, 1], strides = [1, 1]} : vector<4x2xf32> to vector<4x1xf32>
    %24 = arith.addf %22, %23 : vector<4x1xf32>
    %25 = arith.negf %24 : vector<4x1xf32>
    %26 = math.exp %25 : vector<4x1xf32>
    %cst_17 = arith.constant 1.000000e+00 : f32
    %27 = vector.broadcast %cst_17 : f32 to vector<4x1xf32>
    %28 = arith.addf %27, %26 : vector<4x1xf32>
    %29 = arith.divf %27, %28 : vector<4x1xf32>
    %30 = vector.broadcast %29 : vector<4x1xf32> to vector<4x256xf32>
    %31 = arith.mulf %30, %6 : vector<4x256xf32>
    %cst_18 = arith.constant dense<0xFF800000> : vector<256xf32>
    %32 = vector.multi_reduction <maximumf>, %31, %cst_18 [0] : vector<4x256xf32> to vector<256xf32>
    %33 = vector.shape_cast %32 : vector<256xf32> to vector<1x256xf32>
    %cst_19 = arith.constant dense<0.000000e+00> : vector<256xf32>
    %34 = vector.multi_reduction <add>, %31, %cst_19 [0] : vector<4x256xf32> to vector<256xf32>
    %35 = vector.shape_cast %34 : vector<256xf32> to vector<1x256xf32>
    %cst_20 = arith.constant 2.500000e-01 : f32
    %36 = vector.broadcast %cst_20 : f32 to vector<1x256xf32>
    %37 = arith.mulf %35, %36 : vector<1x256xf32>
    %38 = tpu.concatenate %33, %37 in 1 : vector<1x256xf32>, vector<1x256xf32> -> vector<1x512xf32>
    %cst_21 = arith.constant dense<0.000000e+00> : vector<1x256xf32>
    %39 = tpu.matmul %38, %4, %cst_21 {dimension_numbers = #tpu.dot_dimension_numbers<[1], [0], [0], [1], [0, 0, 1, 1], [], []>} : vector<1x512xf32>, vector<512x256xf32>, vector<1x256xf32> -> vector<1x256xf32>
    %40 = vector.broadcast %39 : vector<1x256xf32> to vector<4x256xf32>
    %41 = arith.mulf %40, %31 : vector<4x256xf32>
    %42 = arith.addf %41, %6 : vector<4x256xf32>
    %c0_22 = arith.constant 0 : index
    %c0_23 = arith.constant 0 : index
    %c0_24 = arith.constant 0 : index
    %43 = vector.load %arg7[%c0_22, %c0_23, %c0_24] : memref<1x4x256xf32, #tpu.memory_space<vmem>>, vector<1x4x256xf32>
    %44 = vector.shape_cast %43 : vector<1x4x256xf32> to vector<4x256xf32>
    %45 = vector.shape_cast %42 : vector<4x256xf32> to vector<1x4x256xf32>
    tpu.vector_store %arg7[%c0_22, %c0_23, %c0_24], %45 {strides = array<i32>} : memref<1x4x256xf32, #tpu.memory_space<vmem>>, vector<1x4x256xf32>,
    return
  }
  func.func @transform_0(%arg0: i32) -> (i32, i32, i32) {
    %c0_i32 = arith.constant 0 : i32
    %c0_i32_0 = arith.constant 0 : i32
    %c0_i32_1 = arith.constant 0 : i32
    return %arg0, %c0_i32, %c0_i32_0 : i32, i32, i32
  }
  func.func @transform_1(%arg0: i32) -> (i32, i32) {
    %c0_i32 = arith.constant 0 : i32
    %c0_i32_0 = arith.constant 0 : i32
    %c0_i32_1 = arith.constant 0 : i32
    return %c0_i32, %c0_i32_0 : i32, i32
  }
  func.func @transform_2(%arg0: i32) -> (i32, i32) {
    %c0_i32 = arith.constant 0 : i32
    %c0_i32_0 = arith.constant 0 : i32
    %c0_i32_1 = arith.constant 0 : i32
    return %c0_i32, %c0_i32_0 : i32, i32
  }
  func.func @transform_3(%arg0: i32) -> (i32, i32) {
    %c0_i32 = arith.constant 0 : i32
    %c0_i32_0 = arith.constant 0 : i32
    %c0_i32_1 = arith.constant 0 : i32
    return %c0_i32, %c0_i32_0 : i32, i32
  }
  func.func @transform_4(%arg0: i32) -> (i32, i32) {
    %c0_i32 = arith.constant 0 : i32
    %c0_i32_0 = arith.constant 0 : i32
    %c0_i32_1 = arith.constant 0 : i32
    return %c0_i32, %c0_i32_0 : i32, i32
  }
  func.func @transform_5(%arg0: i32) -> (i32, i32) {
    %c0_i32 = arith.constant 0 : i32
    %c0_i32_0 = arith.constant 0 : i32
    %c0_i32_1 = arith.constant 0 : i32
    return %c0_i32, %c0_i32_0 : i32, i32
  }
  func.func @transform_6(%arg0: i32) -> (i32, i32, i32) {
    %c0_i32 = arith.constant 0 : i32
    %c0_i32_0 = arith.constant 0 : i32
    %c0_i32_1 = arith.constant 0 : i32
    return %arg0, %c0_i32, %c0_i32_0 : i32, i32, i32
  }
}

</mosaic_0001>

<bundles_post_ra>
// kernel: tpu_custom_call.1
= control target key start
LH: loop header
LB: loop body
LE: loop exit
PB: predicated region body
PF: predicated region fallthrough
CT: control target
= control target key end

     0   :  { %11 = vsyncpa [#allocation3], 0  ;;  %s1551_s0 = inlined_call_operand.hbm [shape: f32[2,4,256], index: 0, kind: input, shape index: {}]   ;;  %s1552_s1 = inlined_call_operand.vmem [shape: f32[2,4], index: 1, kind: input, shape index: {}]   ;;  %s1553_s2 = inlined_call_operand.vmem [shape: f32[2,1], index: 2, kind: input, shape index: {}]   ;;  %s1554_s3 = inlined_call_operand.vmem [shape: f32[4,2], index: 3, kind: input, shape index: {}]   ;;  %s1555_s4 = inlined_call_operand.vmem [shape: f32[4,1], index: 4, kind: input, shape index: {}]   ;;  %s1556_s5 = inlined_call_operand.hbm [shape: f32[512,256], index: 5, kind: input, shape index: {}]   ;;  %s1557_s6 = inlined_call_operand.hbm [shape: f32[2,4,256], index: 6, kind: output, shape index: {}]  }
   0x1   :  { %13 = vsyncpa [#allocation3 + $0x1], 0 }
   0x2   :  { %14 = vsyncpa [#allocation6], 0 }
   0x3   :  { %15 = vsyncpa [#allocation4], 0 }
   0x4   :  { %17 = vsyncpa [#allocation4 + $0x1], 0  ;;  %s1312_s21 = smov 0   ;;  %s1314_s22 = smov 0  }
   0x5   :  { %s1316_s23 = smov 0   ;;  %s1318_s24 = smov 0  }
   0x6 LB: > { %s1333_s25 = sadd.s32 4294967295, %s1266_s24   ;;  %s901_s26 = sadd.s32 4294967294, %s1266_s24   ;;  %s1266_s24 = sphi %s1318_s24, %s1577_s24   ;;  %s1262_s23 = sphi %s1316_s23, %s1576_s23   ;;  %s1258_s22 = sphi %s1314_s22, %s1575_s22   ;;  %s1254_s21 = sphi %s1312_s21, %s1574_s21  }
   0x7   : > { %p43_p0 = scmp.ne.s32.totalorder %s1258_s22, %s1254_s21  ;;  %p1558_p1 = scmp.eq.s32.totalorder %s1333_s25, 0 }
   0x8   : > { %p178_p3 = scmp.eq.s32.totalorder %s901_s26, 1  ;;  %p902_p5 = scmp.ge.s32.totalorder %s1266_s24, 1 }
   0x9   : > { %p1342_p4 = por %p1558_p1, %p43_p0  ;;  %p185_p7 = scmp.lt.s32.totalorder %s1266_s24, 3 }
   0xa   : > { %p1347_p6 = por %p178_p3, %p43_p0  ;;  %s1268_s30 = smov [#allocation5]  }
   0xb   : > { %s1561_s27 = scalar_select %p1342_p4, 1, 0 }
   0xc   : > { %s1562_s28 = scalar_select %p1347_p6, 1, 0 }
   0xd   : > { %p1352_p8 = pnand %p902_p5, %p185_p7  ;;  %s209_s7 = sshll.u32 %s1268_s30, 4  ;;  %s1356_s7 = int_to_ptr.vmem [resolvable:$true] %s209_s7 }
   0xe   : > { %s1368_s9 = sadd.s32 1, %s1266_s24   ;;  %s30_s10 = sadd.s32 1, %s1262_s23 }
   0xf   : > { %s1563_s29 = scalar_select %p1352_p8, 1, 0 }
  0x10   : > { %p1076_p9 = pneg %p1352_p8  ;;  %s27_s11 = ssub.s32 %s1266_s24, %s1368_s9 }
  0x11   : > { %s1138_s14 = scalar_lea.hbm %s1556_s5, 16384 }
  0x12   : > { %p1363_p11 = pnand %p1076_p9, %p1558_p1  ;;  %p1139_p12 = scmp.ne.s32.totalorder %s1556_s5, %s1138_s14 }
  0x13   : > { %p1145_p5 = scmp.lt.u32.totalorder %s1138_s14, %s1556_s5 }
  0x14   : > { %p1140_p13 = pneg %p1363_p11 }
  0x16   : > { %p1141_p0 = pnand %p1140_p13, %p1139_p12 }
  0x18   : > { %p1142_p3 = pneg %p1141_p0 }
  0x1a   : > { %p1147_p7 = pnand %p1145_p5, %p1142_p3 }
  0x1c   : > { %1150 = shalt.err (!%p1147_p7)
}
  0x1d   : > { %s1151_s19 = scalar_lea.vmem %s1356_s7, 16384  ;;  %p1159_p2 = scmp.lt.s32.totalorder %s1356_s7, %s1356_s7 }
  0x1e   : > { %p1152_p9 = scmp.ne.s32.totalorder %s1356_s7, %s1151_s19  ;;  %p1160_p6 = scmp.lt.s32.totalorder %s1151_s19, %s1151_s19 }
  0x20   : > { %p1154_p10 = pnand %p1152_p9, %p1140_p13  ;;  %p1161_p4 = por %p1160_p6, %p1159_p2 }
  0x22   : > { %p1155_p1 = pneg %p1154_p10 }
  0x24   : > { %p1162_p8 = pnand %p1161_p4, %p1155_p1 }
  0x26   : > { %1165 = shalt.err (!%p1162_p8)
}
  0x27   : > { %s1269_s20 = smov 256   ;;  %s1270_s26 = smov 16  }
  0x28   : > { %1079 = dma.hbm_to_vmem [thread:$0]  (!%p1363_p11), %s1556_s5, 16384, %s1356_s7, [#allocation6], %s1269_s20, %s1269_s20, %s1270_s26  }
  0x29   : > { %p28_p2 = scmp.eq.s32.totalorder %s27_s11, 0  ;;  %p37_p1 = scmp.ne.s32.totalorder %s1262_s23, %s1258_s22 }
  0x2a   : > { %p38_p4 = scmp.eq.s32.totalorder %s1266_s24, 0  ;;  %p1089_p6 = scmp.lt.s32.totalorder %s1266_s24, 2 }
  0x2b   : > { %s1399_s13 = scalar_select %p28_p2, %s1262_s23, %s30_s10  }
  0x2c   : > { %p39_p8 = por %p38_p4, %p37_p1  ;;  %p1565_p10 = scmp.eq.s32.totalorder %s1333_s25, 1 }
  0x2d   : > { %s223_s15 = sand.u32 1, %s1262_s23   ;;  %s922_s16 = sshll.u32 %s1266_s24, 7 }
  0x2e   : > { %p1403_p12 = por %p1565_p10, %p37_p1  ;;  %s905_s17 = sshll.u32 %s223_s15, 3 }
  0x2f   : > { %s1412_s19 = scalar_lea.hbm %s1551_s0, %s922_s16  ;;  %s227_s7 = scalar_lea.vmem [#allocation2], %s905_s17 }
  0x30   : > { %s235_s10 = sshll.u32 %s227_s7, 4  ;;  %p1414_p11 = pnand %p1089_p6, %p39_p8  ;;  %s1418_s10 = int_to_ptr.vmem [resolvable:$true] %s235_s10 }
  0x31   : > { %s224_s20 = scalar_lea.sflag [#allocation3], %s223_s15  ;;  %s1166_s26 = scalar_lea.hbm %s1412_s19, 128 }
  0x32   : > { %p1167_p13 = scmp.ne.s32.totalorder %s1412_s19, %s1166_s26  ;;  %p1168_p0 = pneg %p1414_p11 }
  0x33   : > { %s1171_s16 = scalar_lea.hbm %s1551_s0, 256  ;;  %p1172_p7 = scmp.lt.u32.totalorder %s1412_s19, %s1551_s0 }
  0x34   : > { %p1169_p3 = pnand %p1168_p0, %p1167_p13  ;;  %p1173_p9 = scmp.lt.u32.totalorder %s1171_s16, %s1166_s26 }
  0x35   : > { %p1175_p1 = scmp.lt.u32.totalorder %s1166_s26, %s1412_s19 }
  0x36   : > { %p1170_p5 = pneg %p1169_p3  ;;  %p1174_p2 = por %p1173_p9, %p1172_p7 }
  0x38   : > { %p1176_p4 = por %p1175_p1, %p1174_p2 }
  0x3a   : > { %p1177_p6 = pnand %p1176_p4, %p1170_p5 }
  0x3c   : > { %1180 = shalt.err (!%p1177_p6)
}
  0x3d   : > { %s1181_s15 = scalar_lea.vmem %s1418_s10, 128  ;;  %s1271_s18 = smov [#allocation2]  }
  0x3e   : > { %p1182_p8 = scmp.ne.s32.totalorder %s1418_s10, %s1181_s15  ;;  %s1186_s7 = sshll.u32 %s1271_s18, 4  ;;  %s1187_s7 = int_to_ptr.vmem [resolvable:$false] %s1186_s7 }
  0x3f   : > { %s1188_s30 = scalar_lea.vmem %s1187_s7, 256  ;;  %p1189_p3 = scmp.lt.s32.totalorder %s1418_s10, %s1187_s7 }
  0x40   : > { %p1184_p10 = pnand %p1182_p8, %p1168_p0  ;;  %p1190_p7 = scmp.lt.s32.totalorder %s1188_s30, %s1181_s15 }
  0x42   : > { %p1185_p13 = pneg %p1184_p10  ;;  %p1191_p9 = por %p1190_p7, %p1189_p3 }
  0x44   : > { %p1192_p2 = pnand %p1191_p9, %p1185_p13 }
  0x46   : > { %1195 = shalt.err (!%p1192_p2)
}
  0x47   : > { %1083 = dma.hbm_to_vmem [thread:$0]  (!%p1414_p11), %s1412_s19, 128, %s1418_s10, %s224_s20  }
  0x48   : > { %p1568_p5 = scmp.ne.s32.totalorder %s1563_s29, 0 }
  0x49   : > { %s1448_s26 = sand.u32 (!%p1568_p5), 1, %s1258_s22   ;;  %p1569_p0 = scmp.ne.s32.totalorder (!%p1568_p5), %s1561_s27, 0 }
  0x4a   : > { %244 = sbr.rel (%p1568_p5) target bundleno = 1196 (0x4ac), region = 44  ;;  %s909_s12 = sshll.u32 (!%p1568_p5), %s1448_s26, 3 }
  0x4b   : > { %s247_s16 = scalar_lea.sflag (!%p1568_p5), [#allocation3], %s1448_s26  ;;  %s250_s17 = scalar_lea.vmem (!%p1568_p5), [#allocation2], %s909_s12 }
  0x51   : > { %1241 = dma.done.wait (%p1569_p0), %s247_s16, 128  }
  0x52   : > { %1243 = vsyncadd (%p1569_p0), %s247_s16, 4294967168  ;;  %p1570_p11 = scmp.eq.s32.totalorder %s1333_s25, 0 }
  0x54   : > { %1245 = dma.done.wait (%p1570_p11), [#allocation6], 16384   ;;  %p1571_p1 = pmov %p1570_p11 }
  0x55   : > { %vm419_vm0 = vcmask 1043456   ;;  %v1462_v0 = vld [vmem:[%s250_s17] sm:$0xff]  ;;  %v1272_v8 = vmov 0.0   ;;  %vm1273_vm1 = vmmov 0   ;;  %v1274_v10 = vmov 0   ;;  %s1275_s18 = smov 127  }
  0x56   : > { %1247 = vsyncadd (%p1571_p1), [#allocation6], 4294950912  ;;  %v1466_v1 = vcombine.high %v1462_v0, %v1462_v0  ;;  %v425_v2 = vsel %vm419_vm0, %v1462_v0, 0.0  ;;  %v420_v4 = vsel %vm419_vm0, %v1462_v0, -inf  ;;  %928 = vmatprep.subr.mxu0 %v1272_v8  ;;  %933 = vmatprep.subr.mxu1 %v1272_v8  ;;  %v284_v9 = vld [vmem:[%s1553_s2] sm:$0x3] }
  0x57   : > { %930 = vmatprep.mubr.msk.f32.mxu0 %vm1273_vm1, %v1272_v8  ;;  %935 = vmatprep.mubr.msk.f32.mxu1 %vm1273_vm1, %v1272_v8  ;;  %v286_v11 = vld [vmem:[%s1555_s4] sm:$0xf]  ;;  %vm431_vm2 = vcmask 7168   ;;  %vm438_vm3 = vcmask 31744   ;;  %vm525_vm4 = vcmask 1041408   ;;  %vm521_vm5 = vcmask 15360  }
  0x58   : > { %v426_v3 = vsel %vm419_vm0, %v1466_v1, 0.0  ;;  %v421_v5 = vsel %vm419_vm0, %v1466_v1, -inf  ;;  %1131 = vset.pattern.permute.xlu1 %v1274_v10  ;;  %1132 = vset.pattern.permute.xlu0 %v1274_v10  ;;  %v283_v15 = vld [vmem:[%s1552_s1] sm:$0x3]  ;;  %v288_v27 = vld [vmem:[#allocation5 + $0x8] sm:$0xff]  ;;  %v290_v28 = vld [vmem:[#allocation5 + $0x18] sm:$0xff] }
  0x59   : > { %v427_v6 = vadd.f32 %v426_v3, %v425_v2  ;;  %v422_v7 = vmax.f32 %v420_v4, %v421_v5  ;;  %435 = vperm.xlu1 %1131, %v284_v9   ;;  %v285_v22 = vld [vmem:[%s1554_s3] sm:$0xf]  ;;  %v287_v29 = vld [vmem:[#allocation5] sm:$0xff]  ;;  %v938_v30 = vpack.c.bf16 %v290_v28, %v288_v27  ;;  %v352_v32 = vld [vmem:[#allocation5 + $0x208] sm:$0xff]  ;;  %s923_s7 = sshll.u32 %s1333_s25, 7  ;;  %s282_s30 = scalar_lea.vmem [#allocation7], %s909_s12 }
  0x5a   : > { %v289_v31 = vld [vmem:[#allocation5 + $0x10] sm:$0xff]  ;;  %v354_v33 = vld [vmem:[#allocation5 + $0x218] sm:$0xff]  ;;  %v351_v36 = vld [vmem:[#allocation5 + $0x200] sm:$0xff]  ;;  %s821_s16 = sshll.u32 %s282_s30, 4  ;;  %s1507_s29 = scalar_lea.hbm %s1557_s6, %s923_s7  ;;  %s1509_s16 = int_to_ptr.vmem [resolvable:$true] %s821_s16 }
  0x5b   : > { %428 = vadd.xlane.f32.xlu0 %v427_v6  ;;  %v940_v34 = vpack.c.bf16 %v289_v31, %v287_v29  ;;  %v1002_v35 = vpack.c.bf16 %v354_v33, %v352_v32  ;;  %v353_v37 = vld [vmem:[#allocation5 + $0x210] sm:$0xff]  ;;  %v292_v38 = vld [vmem:[#allocation5 + $0x28] sm:$0xff]  ;;  %v294_v40 = vld [vmem:[#allocation5 + $0x38] sm:$0xff]  ;;  %s807_s19 = scalar_lea.sflag [#allocation4], %s1448_s26  ;;  %s1196_s10 = scalar_lea.vmem %s1509_s16, 128 }
  0x5c   : > { %v1004_v39 = vpack.c.bf16 %v353_v37, %v351_v36  ;;  %v291_v41 = vld [vmem:[#allocation5 + $0x20] sm:$0xff]  ;;  %v293_v42 = vld [vmem:[#allocation5 + $0x30] sm:$0xff]  ;;  %v942_v43 = vpack.c.bf16 %v294_v40, %v292_v38  ;;  %v356_v45 = vld [vmem:[#allocation5 + $0x228] sm:$0xff]  ;;  %p1197_p4 = scmp.ne.s32.totalorder %s1509_s16, %s1196_s10  ;;  %s1276_s25 = smov [#allocation7]  }
  0x5d   : > { %518 = vperm.xlu1 %1131, %v286_v11   ;;  %v944_v44 = vpack.c.bf16 %v293_v42, %v291_v41  ;;  %v358_v46 = vld [vmem:[#allocation5 + $0x238] sm:$0xff]  ;;  %v355_v47 = vld [vmem:[#allocation5 + $0x220] sm:$0xff]  ;;  %v357_v49 = vld [vmem:[#allocation5 + $0x230] sm:$0xff]  ;;  %s1200_s12 = sshll.u32 %s1276_s25, 4  ;;  %s1201_s12 = int_to_ptr.vmem [resolvable:$false] %s1200_s12 }
  0x5e   : > { %v1006_v48 = vpack.c.bf16 %v358_v46, %v356_v45  ;;  %v296_v50 = vld [vmem:[#allocation5 + $0x48] sm:$0xff]  ;;  %v298_v51 = vld [vmem:[#allocation5 + $0x58] sm:$0xff]  ;;  %v1008_v52 = vpack.c.bf16 %v357_v49, %v355_v47  ;;  %v295_v54 = vld [vmem:[#allocation5 + $0x40] sm:$0xff]  ;;  %p1198_p6 = pnand %p1197_p4, %p1403_p12  ;;  %s1202_s11 = scalar_lea.vmem %s1201_s12, 256 }
  0x5f   : > { %423 = vmax.xlane.f32.xlu0 %v422_v7  ;;  %v946_v53 = vpack.c.bf16 %v298_v51, %v296_v50  ;;  %v297_v55 = vld [vmem:[#allocation5 + $0x50] sm:$0xff]  ;;  %v360_v56 = vld [vmem:[#allocation5 + $0x248] sm:$0xff]  ;;  %v362_v57 = vld [vmem:[#allocation5 + $0x258] sm:$0xff]  ;;  %p1203_p10 = scmp.lt.s32.totalorder %s1509_s16, %s1201_s12  ;;  %p1204_p13 = scmp.lt.s32.totalorder %s1202_s11, %s1196_s10 }
  0x60   : > { %v359_v58 = vld [vmem:[#allocation5 + $0x240] sm:$0xff]  ;;  %v361_v59 = vld [vmem:[#allocation5 + $0x250] sm:$0xff]  ;;  %v948_v60 = vpack.c.bf16 %v297_v55, %v295_v54  ;;  %v1010_v61 = vpack.c.bf16 %v362_v57, %v360_v56  ;;  %v300_v62 = vld [vmem:[#allocation5 + $0x68] sm:$0xff]  ;;  %p1199_p8 = pneg %p1198_p6 }
  0x61   : > { %v302_v63 = vld [vmem:[#allocation5 + $0x78] sm:$0xff]  ;;  %v299_v2 = vld [vmem:[#allocation5 + $0x60] sm:$0xff]  ;;  %v1012_v3 = vpack.c.bf16 %v361_v59, %v359_v58  ;;  %v301_v5 = vld [vmem:[#allocation5 + $0x70] sm:$0xff]  ;;  %p1205_p3 = por %p1204_p13, %p1203_p10 }
  0x62   : > { %v950_v4 = vpack.c.bf16 %v302_v63, %v300_v62  ;;  %v364_v6 = vld [vmem:[#allocation5 + $0x268] sm:$0xff]  ;;  %v366_v7 = vld [vmem:[#allocation5 + $0x278] sm:$0xff]  ;;  %v363_v9 = vld [vmem:[#allocation5 + $0x260] sm:$0xff] }
  0x63   : > { %v1014_v8 = vpack.c.bf16 %v366_v7, %v364_v6  ;;  %v365_v10 = vld [vmem:[#allocation5 + $0x270] sm:$0xff]  ;;  %v304_v11 = vld [vmem:[#allocation5 + $0x88] sm:$0xff]  ;;  %v374_v27 = vld [vmem:[#allocation5 + $0x2b8] sm:$0xff]  ;;  %p1206_p7 = pnand %p1205_p3, %p1199_p8 }
  0x64   : > { %v307_v31 = vld [vmem:[#allocation5 + $0xa0] sm:$0xff]  ;;  %v309_v32 = vld [vmem:[#allocation5 + $0xb0] sm:$0xff]  ;;  %v312_v36 = vld [vmem:[#allocation5 + $0xc8] sm:$0xff] }
  0x65   : > { %v371_v33 = vld [vmem:[#allocation5 + $0x2a0] sm:$0xff]  ;;  %v314_v37 = vld [vmem:[#allocation5 + $0xd8] sm:$0xff]  ;;  %v376_v38 = vld [vmem:[#allocation5 + $0x2c8] sm:$0xff]  ;;  %v960_v40 = vpack.c.bf16 %v309_v32, %v307_v31 }
  0x66   : > { %v962_v42 = vpack.c.bf16 %v314_v37, %v312_v36  ;;  %v375_v45 = vld [vmem:[#allocation5 + $0x2c0] sm:$0xff]  ;;  %v377_v47 = vld [vmem:[#allocation5 + $0x2d0] sm:$0xff]  ;;  %v318_v49 = vld [vmem:[#allocation5 + $0xf8] sm:$0xff] }
  0x67   : > { %v380_v50 = vld [vmem:[#allocation5 + $0x2e8] sm:$0xff]  ;;  %v382_v51 = vld [vmem:[#allocation5 + $0x2f8] sm:$0xff]  ;;  %v315_v55 = vld [vmem:[#allocation5 + $0xe0] sm:$0xff] }
  0x68   : > { %v317_v56 = vld [vmem:[#allocation5 + $0xf0] sm:$0xff]  ;;  %v379_v57 = vld [vmem:[#allocation5 + $0x2e0] sm:$0xff]  ;;  %v1030_v58 = vpack.c.bf16 %v382_v51, %v380_v50  ;;  %v384_v62 = vld [vmem:[#allocation5 + $0x308] sm:$0xff] }
  0x69   : > { %v381_v59 = vld [vmem:[#allocation5 + $0x2f0] sm:$0xff]  ;;  %v386_v63 = vld [vmem:[#allocation5 + $0x318] sm:$0xff]  ;;  %v383_v7 = vld [vmem:[#allocation5 + $0x300] sm:$0xff] }
  0x6a   : > { %v321_v6 = vld [vmem:[#allocation5 + $0x110] sm:$0xff]  ;;  %v391_v32 = vld [vmem:[#allocation5 + $0x340] sm:$0xff]  ;;  %v334_v36 = vld [vmem:[#allocation5 + $0x178] sm:$0xff] }
  0x6b   : > { %v329_v31 = vld [vmem:[#allocation5 + $0x150] sm:$0xff]  ;;  %v396_v37 = vld [vmem:[#allocation5 + $0x368] sm:$0xff] }
  0xd8   : > { %v436_v17 = vpop.permute.xlu1 %435 }
  0xdc   : > { %v519_v23 = vpop.permute.xlu1 %518 }
  0xe8   : > { %v429_v12 = vpop.xlane.xlu0 %428 }
  0xe9   : > { %v430_v13 = vmul.f32 0.00390625, %v429_v12  ;;  %v306_v12 = vld [vmem:[#allocation5 + $0x98] sm:$0xff] }
  0xec   : > { %v424_v14 = vpop.xlane.xlu0 %423 }
  0xed   : > { %v432_v16 = vsel %vm431_vm2, %v424_v14, %v430_v13  ;;  %v952_v13 = vpack.c.bf16 %v301_v5, %v299_v2  ;;  %v368_v14 = vld [vmem:[#allocation5 + $0x288] sm:$0xff]  ;;  %v968_v2 = vpack.c.bf16 %v317_v56, %v315_v55  ;;  %v319_v5 = vld [vmem:[#allocation5 + $0x100] sm:$0xff]  ;;  %v338_v55 = vld [vmem:[#allocation5 + $0x198] sm:$0xff] }
  0xee   : > { %929 = vmatpush3.msk.msra.mxu0 %vm419_vm0, %v432_v16  ;;  %v1016_v16 = vpack.c.bf16 %v365_v10, %v363_v9  ;;  %v385_v9 = vld [vmem:[#allocation5 + $0x310] sm:$0xff]  ;;  %v324_v10 = vld [vmem:[#allocation5 + $0x128] sm:$0xff] }
  0xef   : > { %931 = vmatmul.mubr.msk.f32.vlgmr.msra.gmra.mrb[0].mxu0 %vm438_vm3, %v283_v15  ;;  %1003 = vmatprep.subr.bf16.mxu0 %v1002_v35  ;;  %v370_v15 = vld [vmem:[#allocation5 + $0x298] sm:$0xff]  ;;  %v373_v35 = vld [vmem:[#allocation5 + $0x2b0] sm:$0xff] }
  0xf0   : > { %1005 = vmatpush1.bf16.msra.mxu0 %v1004_v39  ;;  %v378_v39 = vld [vmem:[#allocation5 + $0x2d8] sm:$0xff]  ;;  %v1024_v41 = vpack.c.bf16 %v373_v35, %v371_v33  ;;  %v332_v35 = vld [vmem:[#allocation5 + $0x168] sm:$0xff] }
  0xf1   : > { %1007 = vmatprep.subr.bf16.mxu0 %v1006_v48  ;;  %v1026_v46 = vpack.c.bf16 %v378_v39, %v376_v38  ;;  %v316_v48 = vld [vmem:[#allocation5 + $0xe8] sm:$0xff]  ;;  %v398_v38 = vld [vmem:[#allocation5 + $0x378] sm:$0xff] }
  0xf2   : > { %v966_v54 = vpack.c.bf16 %v318_v49, %v316_v48 }
  0xf4   : > { %1009 = vmatpush1.bf16.msra.mxu0 %v1008_v52 }
  0xf5   : > { %1011 = vmatprep.subr.bf16.mxu0 %v1010_v61  ;;  %v322_v61 = vld [vmem:[#allocation5 + $0x118] sm:$0xff] }
  0xf8   : > { %1013 = vmatpush1.bf16.msra.mxu0 %v1012_v3  ;;  %v1032_v3 = vpack.c.bf16 %v381_v59, %v379_v57  ;;  %v335_v57 = vld [vmem:[#allocation5 + $0x180] sm:$0xff] }
  0xf9   : > { %1015 = vmatprep.subr.bf16.mxu0 %v1014_v8  ;;  %v1034_v8 = vpack.c.bf16 %v386_v63, %v384_v62  ;;  %v402_v62 = vld [vmem:[#allocation5 + $0x398] sm:$0xff] }
  0xfc   : > { %1017 = vmatpush1.bf16.msra.mxu0 %v1016_v16 }
 0x1c2   : > { %v511_v18 = vpop.f32.mrb[0].mxu0 }
 0x1c3   : > { %v512_v19 = vadd.f32 %v511_v18, %v436_v17  ;;  %v932_v20 = vpop.f32.mrb[1].mxu0  ;;  %v954_v17 = vpack.c.bf16 %v306_v12, %v304_v11  ;;  %v303_v18 = vld [vmem:[#allocation5 + $0x80] sm:$0xff]  ;;  %v326_v11 = vld [vmem:[#allocation5 + $0x138] sm:$0xff]  ;;  %v388_v12 = vld [vmem:[#allocation5 + $0x328] sm:$0xff] }
 0x1c4   : > { %v367_v20 = vld [vmem:[#allocation5 + $0x280] sm:$0xff]  ;;  %v974_v16 = vpack.c.bf16 %v326_v11, %v324_v10  ;;  %v404_v10 = vld [vmem:[#allocation5 + $0x3a8] sm:$0xff]  ;;  %v406_v11 = vld [vmem:[#allocation5 + $0x3b8] sm:$0xff] }
 0x1c5   : > { %v515_v21 = vmax.f32 %v512_v19, 0.0  ;;  %v305_v19 = vld [vmem:[#allocation5 + $0x90] sm:$0xff] }
 0x1c6   : > { %v956_v28 = vpack.c.bf16 %v305_v19, %v303_v18  ;;  %v325_v18 = vld [vmem:[#allocation5 + $0x130] sm:$0xff]  ;;  %v387_v19 = vld [vmem:[#allocation5 + $0x320] sm:$0xff] }
 0x1c7   : > { %934 = vmatpush3.msk.msra.mxu1 %vm525_vm4, %v515_v21  ;;  %v1018_v21 = vpack.c.bf16 %v370_v15, %v368_v14  ;;  %v972_v14 = vpack.c.bf16 %v321_v6, %v319_v5  ;;  %v1036_v15 = vpack.c.bf16 %v385_v9, %v383_v7  ;;  %v342_v5 = vld [vmem:[#allocation5 + $0x1b8] sm:$0xff]  ;;  %v339_v7 = vld [vmem:[#allocation5 + $0x1a0] sm:$0xff] }
 0x1c8   : > { %936 = vmatmul.mubr.msk.f32.vlgmr.msra.gmra.mrb[0].mxu1 %vm521_vm5, %v285_v22  ;;  %939 = vmatprep.subr.bf16.mxu1 %v938_v30  ;;  %v369_v22 = vld [vmem:[#allocation5 + $0x290] sm:$0xff] }
 0x1c9   : > { %941 = vmatpush1.bf16.msra.mxu1 %v940_v34  ;;  %v1020_v29 = vpack.c.bf16 %v369_v22, %v367_v20  ;;  %1019 = vmatprep.subr.bf16.mxu0 %v1018_v21  ;;  %v389_v21 = vld [vmem:[#allocation5 + $0x330] sm:$0xff]  ;;  %v328_v22 = vld [vmem:[#allocation5 + $0x148] sm:$0xff] }
 0x1ca   : > { %943 = vmatprep.subr.bf16.mxu1 %v942_v43  ;;  %v311_v43 = vld [vmem:[#allocation5 + $0xc0] sm:$0xff] }
 0x1cb   : > { %1021 = vmatpush1.bf16.msra.mxu0 %v1020_v29 }
 0x1cd   : > { %945 = vmatpush1.bf16.msra.mxu1 %v944_v44  ;;  %v313_v44 = vld [vmem:[#allocation5 + $0xd0] sm:$0xff] }
 0x1ce   : > { %947 = vmatprep.subr.bf16.mxu1 %v946_v53  ;;  %v964_v52 = vpack.c.bf16 %v313_v44, %v311_v43  ;;  %v1028_v53 = vpack.c.bf16 %v377_v47, %v375_v45  ;;  %v333_v43 = vld [vmem:[#allocation5 + $0x170] sm:$0xff]  ;;  %v1046_v44 = vpack.c.bf16 %v398_v38, %v396_v37  ;;  %v395_v45 = vld [vmem:[#allocation5 + $0x360] sm:$0xff] }
 0x1cf   : > { %v411_v38 = vld [vmem:[#allocation5 + $0x3e0] sm:$0xff] }
 0x1d1   : > { %949 = vmatpush1.bf16.msra.mxu1 %v948_v60  ;;  %v320_v60 = vld [vmem:[#allocation5 + $0x108] sm:$0xff] }
 0x1d2   : > { %951 = vmatprep.subr.bf16.mxu1 %v950_v4  ;;  %v970_v4 = vpack.c.bf16 %v322_v61, %v320_v60  ;;  %v400_v61 = vld [vmem:[#allocation5 + $0x388] sm:$0xff] }
 0x1d3   : > { %v1050_v63 = vpack.c.bf16 %v402_v62, %v400_v61 }
 0x1d5   : > { %953 = vmatpush1.bf16.msra.mxu1 %v952_v13  ;;  %v390_v13 = vld [vmem:[#allocation5 + $0x338] sm:$0xff] }
 0x1d6   : > { %955 = vmatprep.subr.bf16.mxu1 %v954_v17  ;;  %v323_v17 = vld [vmem:[#allocation5 + $0x120] sm:$0xff]  ;;  %v1038_v20 = vpack.c.bf16 %v390_v13, %v388_v12  ;;  %v1054_v12 = vpack.c.bf16 %v406_v11, %v404_v10  ;;  %v789_v11 = vlaneseq }
 0x1d7   : > { %v403_v13 = vld [vmem:[#allocation5 + $0x3a0] sm:$0xff] }
 0x1d9   : > { %957 = vmatpush1.bf16.msra.mxu1 %v956_v28  ;;  %v1040_v28 = vpack.c.bf16 %v389_v21, %v387_v19  ;;  %v343_v19 = vld [vmem:[#allocation5 + $0x1c0] sm:$0xff] }
 0x29b   : > { %v595_v24 = vpop.f32.mrb[0].mxu1 }
 0x29c   : > { %v1489_v25 = vadd.f32 %v595_v24, %v519_v23  ;;  %v937_v26 = vpop.f32.mrb[1].mxu1  ;;  %v308_v23 = vld [vmem:[#allocation5 + $0xa8] sm:$0xff]  ;;  %v310_v24 = vld [vmem:[#allocation5 + $0xb8] sm:$0xff] }
 0x29d   : > { %v372_v26 = vld [vmem:[#allocation5 + $0x2a8] sm:$0xff]  ;;  %v958_v30 = vpack.c.bf16 %v310_v24, %v308_v23  ;;  %v330_v23 = vld [vmem:[#allocation5 + $0x158] sm:$0xff] }
 0x29e   : > { %600 = vrot.lane.b32.xlu0 %v1489_v25, %s1275_s18  ;;  %v1022_v34 = vpack.c.bf16 %v374_v27, %v372_v26  ;;  %v392_v24 = vld [vmem:[#allocation5 + $0x348] sm:$0xff]  ;;  %v394_v26 = vld [vmem:[#allocation5 + $0x358] sm:$0xff]  ;;  %v976_v27 = vpack.c.bf16 %v325_v18, %v323_v17  ;;  %v978_v29 = vpack.c.bf16 %v330_v23, %v328_v22 }
 0x29f   : > { %959 = vmatprep.subr.bf16.mxu1 %v958_v30  ;;  %v327_v30 = vld [vmem:[#allocation5 + $0x140] sm:$0xff]  ;;  %v1042_v33 = vpack.c.bf16 %v394_v26, %v392_v24  ;;  %v346_v17 = vld [vmem:[#allocation5 + $0x1d8] sm:$0xff]  ;;  %v408_v22 = vld [vmem:[#allocation5 + $0x3c8] sm:$0xff] }
 0x2a0   : > { %1023 = vmatprep.subr.bf16.mxu0 %v1022_v34  ;;  %961 = vmatpush1.bf16.msra.mxu1 %v960_v40  ;;  %v393_v34 = vld [vmem:[#allocation5 + $0x350] sm:$0xff]  ;;  %v980_v39 = vpack.c.bf16 %v329_v31, %v327_v30  ;;  %v410_v23 = vld [vmem:[#allocation5 + $0x3d8] sm:$0xff]  ;;  %v407_v26 = vld [vmem:[#allocation5 + $0x3c0] sm:$0xff] }
 0x2a1   : > { %1025 = vmatpush1.bf16.msra.mxu0 %v1024_v41  ;;  %963 = vmatprep.subr.bf16.mxu1 %v962_v42  ;;  %v1044_v40 = vpack.c.bf16 %v393_v34, %v391_v32  ;;  %v982_v41 = vpack.c.bf16 %v334_v36, %v332_v35  ;;  %v331_v42 = vld [vmem:[#allocation5 + $0x160] sm:$0xff]  ;;  %v1058_v24 = vpack.c.bf16 %v410_v23, %v408_v22  ;;  %v350_v30 = vld [vmem:[#allocation5 + $0x1f8] sm:$0xff]  ;;  %v412_v34 = vld [vmem:[#allocation5 + $0x3e8] sm:$0xff] }
 0x2a2   : > { %1027 = vmatprep.subr.bf16.mxu0 %v1026_v46  ;;  %v397_v46 = vld [vmem:[#allocation5 + $0x370] sm:$0xff]  ;;  %v984_v47 = vpack.c.bf16 %v333_v43, %v331_v42  ;;  %v347_v31 = vld [vmem:[#allocation5 + $0x1e0] sm:$0xff]  ;;  %v414_v35 = vld [vmem:[#allocation5 + $0x3f8] sm:$0xff] }
 0x2a3   : > { %v1048_v48 = vpack.c.bf16 %v397_v46, %v395_v45  ;;  %v1062_v37 = vpack.c.bf16 %v414_v35, %v412_v34 }
 0x2a4   : > { %965 = vmatpush1.bf16.msra.mxu1 %v964_v52 }
 0x2a5   : > { %1029 = vmatpush1.bf16.msra.mxu0 %v1028_v53  ;;  %967 = vmatprep.subr.bf16.mxu1 %v966_v54  ;;  %v336_v54 = vld [vmem:[#allocation5 + $0x188] sm:$0xff] }
 0x2a6   : > { %1031 = vmatprep.subr.bf16.mxu0 %v1030_v58  ;;  %v986_v56 = vpack.c.bf16 %v338_v55, %v336_v54  ;;  %v337_v58 = vld [vmem:[#allocation5 + $0x190] sm:$0xff] }
 0x2a7   : > { %v988_v60 = vpack.c.bf16 %v337_v58, %v335_v57 }
 0x2a8   : > { %969 = vmatpush1.bf16.msra.mxu1 %v968_v2  ;;  %v399_v2 = vld [vmem:[#allocation5 + $0x380] sm:$0xff] }
 0x2a9   : > { %1033 = vmatpush1.bf16.msra.mxu0 %v1032_v3  ;;  %971 = vmatprep.subr.bf16.mxu1 %v970_v4  ;;  %v401_v3 = vld [vmem:[#allocation5 + $0x390] sm:$0xff]  ;;  %v340_v4 = vld [vmem:[#allocation5 + $0x1a8] sm:$0xff] }
 0x2aa   : > { %1035 = vmatprep.subr.bf16.mxu0 %v1034_v8  ;;  %v990_v6 = vpack.c.bf16 %v342_v5, %v340_v4  ;;  %v341_v8 = vld [vmem:[#allocation5 + $0x1b0] sm:$0xff] }
 0x2ab   : > { %v992_v9 = vpack.c.bf16 %v341_v8, %v339_v7 }
 0x2ac   : > { %973 = vmatpush1.bf16.msra.mxu1 %v972_v14  ;;  %v405_v14 = vld [vmem:[#allocation5 + $0x3b0] sm:$0xff] }
 0x2ad   : > { %1037 = vmatpush1.bf16.msra.mxu0 %v1036_v15  ;;  %975 = vmatprep.subr.bf16.mxu1 %v974_v16  ;;  %v1056_v15 = vpack.c.bf16 %v405_v14, %v403_v13  ;;  %v344_v16 = vld [vmem:[#allocation5 + $0x1c8] sm:$0xff] }
 0x2ae   : > { %1039 = vmatprep.subr.bf16.mxu0 %v1038_v20  ;;  %v994_v18 = vpack.c.bf16 %v346_v17, %v344_v16  ;;  %v345_v20 = vld [vmem:[#allocation5 + $0x1d0] sm:$0xff] }
 0x2af   : > { %v996_v21 = vpack.c.bf16 %v345_v20, %v343_v19 }
 0x2b0   : > { %977 = vmatpush1.bf16.msra.mxu1 %v976_v27  ;;  %v409_v27 = vld [vmem:[#allocation5 + $0x3d0] sm:$0xff] }
 0x2b1   : > { %1041 = vmatpush1.bf16.msra.mxu0 %v1040_v28  ;;  %979 = vmatprep.subr.bf16.mxu1 %v978_v29  ;;  %v1060_v28 = vpack.c.bf16 %v409_v27, %v407_v26  ;;  %v348_v29 = vld [vmem:[#allocation5 + $0x1e8] sm:$0xff] }
 0x2b2   : > { %1043 = vmatprep.subr.bf16.mxu0 %v1042_v33  ;;  %v998_v32 = vpack.c.bf16 %v350_v30, %v348_v29  ;;  %v349_v33 = vld [vmem:[#allocation5 + $0x1f0] sm:$0xff] }
 0x2b3   : > { %v1000_v36 = vpack.c.bf16 %v349_v33, %v347_v31 }
 0x2b4   : > { %981 = vmatpush1.bf16.msra.mxu1 %v980_v39  ;;  %v413_v39 = vld [vmem:[#allocation5 + $0x3f0] sm:$0xff] }
 0x2b5   : > { %1045 = vmatpush1.bf16.msra.mxu0 %v1044_v40  ;;  %983 = vmatprep.subr.bf16.mxu1 %v982_v41  ;;  %v1064_v40 = vpack.c.bf16 %v413_v39, %v411_v38 }
 0x2b6   : > { %1047 = vmatprep.subr.bf16.mxu0 %v1046_v44 }
 0x2b8   : > { %985 = vmatpush1.bf16.msra.mxu1 %v984_v47 }
 0x2b9   : > { %1049 = vmatpush1.bf16.msra.mxu0 %v1048_v48  ;;  %987 = vmatprep.subr.bf16.mxu1 %v986_v56 }
 0x2ba   : > { %1051 = vmatprep.subr.bf16.mxu0 %v1050_v63 }
 0x2bc   : > { %989 = vmatpush1.bf16.msra.mxu1 %v988_v60 }
 0x2bd   : > { %991 = vmatprep.subr.bf16.mxu1 %v990_v6 }
 0x2c0   : > { %993 = vmatpush1.bf16.msra.mxu1 %v992_v9 }
 0x2c1   : > { %995 = vmatprep.subr.bf16.mxu1 %v994_v18 }
 0x2c4   : > { %997 = vmatpush1.bf16.msra.mxu1 %v996_v21 }
 0x2c5   : > { %999 = vmatprep.subr.bf16.mxu1 %v998_v32 }
 0x2c8   : > { %1001 = vmatpush1.bf16.msra.mxu1 %v1000_v36 }
 0x310   : > { %v601_v49 = vpop.permute.xlu0 %600 }
 0x311   : > { %v603_v50 = vadd.f32 %v601_v49, %v1489_v25  ;;  %v1052_v25 = vpack.c.bf16 %v401_v3, %v399_v2 }
 0x313   : > { %v916_v51 = vmul.f32 -1.442695, %v603_v50  ;;  %1053 = vmatpush1.bf16.msra.mxu0 %v1052_v25 }
 0x314   : > { %1055 = vmatprep.subr.bf16.mxu0 %v1054_v12  ;;  %v790_v12 = vshrl.u32 %v789_v11, 7 }
 0x315   : > { %1134 = vpow2.f32 %v916_v51 }
 0x317   : > { %1057 = vmatpush1.bf16.msra.mxu0 %v1056_v15  ;;  %v791_v15 = vsub.s32 0, %v790_v12 }
 0x318   : > { %1059 = vmatprep.subr.bf16.mxu0 %v1058_v24 }
 0x31b   : > { %1061 = vmatpush1.bf16.msra.mxu0 %v1060_v28 }
 0x31c   : > { %1063 = vmatprep.subr.bf16.mxu0 %v1062_v37 }
 0x31f   : > { %v1135_v52 = vpop.eup %1134  ;;  %1065 = vmatpush1.bf16.msra.mxu0 %v1064_v40 }
 0x320   : > { %v607_v53 = vadd.f32 1.0, %v1135_v52 }
 0x322   : > { %1136 = vrcp.f32 %v607_v53 }
 0x32c   : > { %v1137_v59 = vpop.eup %1136 }
 0x32d   : > { %612 = vperm.xlu1 %1131, %v1137_v59  }
 0x3ac   : > { %v613_v41 = vpop.permute.xlu1 %612 }
 0x3ad   : > { %v615_v42 = vmul.f32 %v613_v41, %v1462_v0  ;;  %v616_v43 = vmul.f32 %v613_v41, %v1466_v1 }
 0x3af   : > { %v617_v44 = vsel %vm419_vm0, %v615_v42, -inf  ;;  %v624_v45 = vsel %vm419_vm0, %v616_v43, -inf  ;;  %v631_v46 = vsel %vm419_vm0, %v615_v42, 0.0  ;;  %v638_v47 = vsel %vm419_vm0, %v616_v43, 0.0 }
 0x3b0   : > { %v618_v48 = vrot.slane %v617_v44, 4  ;;  %v625_v49 = vrot.slane %v624_v45, 4  ;;  %v632_v50 = vrot.slane %v631_v46, 4  ;;  %v639_v51 = vrot.slane %v638_v47, 4 }
 0x3b2   : > { %v619_v52 = vmax.f32 %v617_v44, %v618_v48  ;;  %v626_v53 = vmax.f32 %v624_v45, %v625_v49  ;;  %v633_v54 = vadd.f32 %v632_v50, %v631_v46  ;;  %v640_v55 = vadd.f32 %v639_v51, %v638_v47 }
 0x3b4   : > { %v620_v56 = vrot.slane %v619_v52, 2  ;;  %v634_v57 = vrot.slane %v633_v54, 2  ;;  %v641_v58 = vrot.slane %v640_v55, 2  ;;  %v627_v59 = vrot.slane %v626_v53, 2 }
 0x3b6   : > { %v621_v60 = vmax.f32 %v619_v52, %v620_v56  ;;  %v635_v61 = vadd.f32 %v634_v57, %v633_v54  ;;  %v628_v62 = vmax.f32 %v626_v53, %v627_v59  ;;  %v642_v63 = vadd.f32 %v641_v58, %v640_v55 }
 0x3b8   : > { %v629_v2 = vrot.slane %v628_v62, 1  ;;  %v622_v3 = vrot.slane %v621_v60, 1  ;;  %v643_v25 = vrot.slane %v642_v63, 1  ;;  %v636_v4 = vrot.slane %v635_v61, 1 }
 0x3ba   : > { %v630_v5 = vmax.f32 %v628_v62, %v629_v2  ;;  %v623_v6 = vmax.f32 %v621_v60, %v622_v3  ;;  %v644_v7 = vadd.f32 %v643_v25, %v642_v63  ;;  %v637_v8 = vadd.f32 %v636_v4, %v635_v61 }
 0x3bc   : > { %711 = vmatprep.mubr.f32.mxu1 %v630_v5  ;;  %v646_v9 = vmul.f32 0.25, %v644_v7  ;;  %v645_v10 = vmul.f32 0.25, %v637_v8 }
 0x3bd   : > { %712 = vmatmul.mubr.f32.vlgmr.msra.gmra.mrb[2].mxu1 %v623_v6 }
 0x3be   : > { %782 = vmatprep.mubr.f32.mxu0 %v646_v9 }
 0x3bf   : > { %783 = vmatmul.mubr.f32.vlgmr.msra.gmra.mrb[2].mxu0 %v645_v10 }
 0x490   : > { %v713_v13 = vpop.f32.mrb[2].mxu1 }
 0x491   : > { %v715_v14 = vpop.f32.mrb[3].mxu1 }
 0x492   : > { %v784_v16 = vpop.f32.mrb[2].mxu0 }
 0x493   : > { %v785_v17 = vadd.f32 %v784_v16, %v713_v13  ;;  %v786_v18 = vpop.f32.mrb[3].mxu0 }
 0x494   : > { %v787_v19 = vadd.f32 %v786_v18, %v715_v14 }
 0x495   : > { %v792_v20 = vrot.slane %v785_v17, %v791_v15 }
 0x496   : > { %v796_v21 = vrot.slane %v787_v19, %v791_v15 }
 0x497   : > { %v797_v22 = vmul.f32 %v792_v20, %v615_v42 }
 0x498   : > { %v798_v23 = vmul.f32 %v796_v21, %v616_v43 }
 0x499   : > { %v799_v24 = vadd.f32 %v797_v22, %v1462_v0 }
 0x49a   : > { %v800_v26 = vadd.f32 %v798_v23, %v1466_v1 }
 0x49c   : > { %v803_v27 = vcombine.low %v799_v24, %v800_v26 }
 0x49e   : > { %805 = vst [vmem:[%s282_s30] sm:$0xff] %v803_v27 }
 0x49f   : > { %1209 = shalt.err (!%p1206_p7)
}
 0x4a0   : > { %s1210_s26 = scalar_lea.hbm %s1507_s29, 128  ;;  %s1214_s15 = scalar_lea.hbm %s1557_s6, 256 }
 0x4a1   : > { %p1211_p9 = scmp.ne.s32.totalorder %s1507_s29, %s1210_s26  ;;  %p1215_p0 = scmp.lt.u32.totalorder %s1507_s29, %s1557_s6 }
 0x4a2   : > { %p1216_p11 = scmp.lt.u32.totalorder %s1214_s15, %s1210_s26  ;;  %p1218_p4 = scmp.lt.u32.totalorder %s1210_s26, %s1507_s29 }
 0x4a3   : > { %p1212_p2 = pnand %p1211_p9, %p1403_p12 }
 0x4a4   : > { %p1217_p1 = por %p1216_p11, %p1215_p0 }
 0x4a5   : > { %p1213_p5 = pneg %p1212_p2 }
 0x4a6   : > { %p1219_p6 = por %p1218_p4, %p1217_p1 }
 0x4a8   : > { %p1220_p8 = pnand %p1219_p6, %p1213_p5 }
 0x4aa   : > { %1223 = shalt.err (!%p1220_p8)
}
 0x4ab   : > { %1074 = dma.vmem_to_hbm [thread:$0]  (%p1403_p12), %s1509_s16, 128, %s1507_s29, %s807_s19  }
 0x4ac PF: > { %s833_s30 = sand.u32 1, %s1254_s21   ;;  %p1572_p10 = scmp.ne.s32.totalorder %s1562_s28, 0 }
 0x4ad   : > { %p1573_p13 = scmp.ge.s32.totalorder %s1266_s24, 2  ;;  %s834_s17 = scalar_lea.sflag [#allocation4], %s833_s30 }
 0x4af   : > { %p1085_p3 = pnand %p1573_p13, %p1572_p10 }
 0x4b1   : > { %1249 = dma.done.wait (!%p1085_p3), %s834_s17, 128  }
 0x4b2   : > { %1251 = vsyncadd (!%p1085_p3), %s834_s17, 4294967168  ;;  %p20_p7 = scmp.ge.s32.totalorder %s1368_s9, 4   ;;  %s1574_s21 = smov %s1258_s22 }
 0x4b3   : > { %s1575_s22 = smov %s1262_s23  ;;  %s1576_s23 = smov %s1399_s13 }
 0x4b4   : > { %s1577_s24 = smov %s1368_s9  ;;  %22 = sbr.rel (!%p20_p7) target bundleno = 6 (0x6), region = 93 }
 0x4bb   :  { %839 = vsyncpa [#allocation3], 1 }
 0x4bc   :  { %841 = vsyncpa [#allocation3 + $0x1], 1 }
 0x4bd   :  { %842 = vsyncpa [#allocation6], 1 }
 0x4be   :  { %843 = vsyncpa [#allocation4], 1 }
 0x4bf   :  { %845 = vsyncpa [#allocation4 + $0x1], 1 }

</bundles_post_ra>
